<compile_context>
chip_gen: v7x
topology: tpu7x:2x2x1
jax: 0.10.0
libtpu: 0.0.40
codegen_flags: <defaults>
</compile_context>

<pallas_src>
import functools

import numpy as np
import jax
import jax.numpy as jnp
from jax import lax
from jax.experimental import pallas as pl
from jax.experimental.pallas import tpu as pltpu

LOG_STD_MAX = 2.0
LOG_STD_MIN = -20.0
HIDDEN_DIM = 256
BATCH_BLOCK = 256  # per-grid-step batch tile for large rollout batches


def actor_kernel(x_ref, w1_ref, w2_ref, wh_ref, b12_ref, bh_ref, out_ref,
                 *, action_dim):
    """Whole Actor MLP in one kernel.

    x_ref:   (B, F)   f32
    w1_ref:  (F, H)   bf16
    w2_ref:  (H, H)   bf16
    wh_ref:  (H, 2A)  bf16   (fc_mean || fc_logstd weights)
    b12_ref: (2, H)   f32    (row 0 = fc1 bias, row 1 = fc2 bias)
    bh_ref:  (1, 2A)  f32    (fc_mean bias || fc_logstd bias)
    out_ref: (B, 2A)  f32    (tanh(mean) || clipped log_std)
    """
    x = x_ref[...].astype(jnp.bfloat16)                                    # (B, F)

    h1 = jnp.dot(x, w1_ref[...], preferred_element_type=jnp.float32)      # (B, H)
    h1 = jnp.maximum(h1 + b12_ref[0:1, :], 0.0)                           # relu, f32

    h2 = jnp.dot(h1.astype(jnp.bfloat16), w2_ref[...],
                 preferred_element_type=jnp.float32)                      # (B, H)
    h2 = jnp.maximum(h2 + b12_ref[1:2, :], 0.0)                           # relu, f32

    heads = jnp.dot(h2.astype(jnp.bfloat16), wh_ref[...],
                    preferred_element_type=jnp.float32)                   # (B, 2A)
    heads = heads + bh_ref[...]

    # First A lanes = mean head (tanh), next A lanes = log_std head (clip).
    # Lane mask avoids materializing slice + concatenate copies in VMEM.
    lane = lax.broadcasted_iota(jnp.int32, heads.shape, 1)
    out_ref[...] = jnp.where(
        lane < action_dim,
        jnp.tanh(heads),
        jnp.clip(heads, LOG_STD_MIN, LOG_STD_MAX),
    )


def actor_forward(features, params):
    """Wrapper around pallas_call. features: (B, F) float32.

    Returns (mean, log_std), each (B, A) float32, matching Actor.forward.
    """
    B, F = features.shape
    H = params["w1"].shape[1]
    two_a = params["wh"].shape[1]
    A = two_a // 2

    kernel = functools.partial(actor_kernel, action_dim=A)

    flops = 2 * B * (F * H + H * H + H * two_a)
    bytes_accessed = int(
        B * F * 4                       # features (f32)
        + F * H * 2 + H * H * 2         # w1, w2 (bf16)
        + H * two_a * 2                 # fused head weight (bf16)
        + 2 * H * 4 + two_a * 4         # packed biases (f32)
        + B * two_a * 4                 # fused output (f32)
    )
    cost = pl.CostEstimate(flops=flops, transcendentals=B * two_a,
                           bytes_accessed=bytes_accessed)

    args = (features, params["w1"], params["w2"], params["wh"],
            params["b12"], params["bh"])

    use_grid = (B > BATCH_BLOCK) and (B % BATCH_BLOCK == 0)
    if use_grid:
        # Batch-tiled path: split B across grid steps; on v7x the "parallel"
        # axis is sharded across the two TensorCores.  Weights are small
        # (~300 KB) and stay VMEM-resident (index_map always returns (0, 0)).
        out = pl.pallas_call(
            kernel,
            out_shape=jax.ShapeDtypeStruct((B, two_a), jnp.float32),
            grid=(B // BATCH_BLOCK,),
            in_specs=[
                pl.BlockSpec((BATCH_BLOCK, F), lambda i: (i, 0)),
                pl.BlockSpec((F, H), lambda i: (0, 0)),
                pl.BlockSpec((H, H), lambda i: (0, 0)),
                pl.BlockSpec((H, two_a), lambda i: (0, 0)),
                pl.BlockSpec((2, H), lambda i: (0, 0)),
                pl.BlockSpec((1, two_a), lambda i: (0, 0)),
            ],
            out_specs=pl.BlockSpec((BATCH_BLOCK, two_a), lambda i: (i, 0)),
            compiler_params=pltpu.CompilerParams(
                dimension_semantics=("parallel",)),
            cost_estimate=cost,
        )(*args)
    else:
        # Small-batch path: single block, everything in VMEM, no grid.
        vmem = pl.BlockSpec(memory_space=pltpu.VMEM)
        out = pl.pallas_call(
            kernel,
            out_shape=jax.ShapeDtypeStruct((B, two_a), jnp.float32),
            in_specs=[vmem] * 6,
            out_specs=vmem,
            cost_estimate=cost,
        )(*args)

    return out[:, :A], out[:, A:]


def init_actor_params(key, features_dim, action_dim, hidden_dim=HIDDEN_DIM,
                      initial_action_std=1.0):
    """Deterministic synthetic init mirroring Actor.__init__ shapes/semantics,
    packed into the fused/bf16 layout the kernel expects."""
    k1, k2, k3 = jax.random.split(key, 3)

    def uniform_linear(k, fan_in, shape):
        # PyTorch default Linear init: U(-1/sqrt(fan_in), 1/sqrt(fan_in))
        bound = 1.0 / np.sqrt(fan_in)
        return jax.random.uniform(k, shape, jnp.float32, -bound, bound)

    # fc1, fc2 (weights stored as (in, out))
    w1 = uniform_linear(k1, features_dim, (features_dim, hidden_dim))
    b1 = jnp.zeros((hidden_dim,), jnp.float32)
    w2 = uniform_linear(k2, hidden_dim, (hidden_dim, hidden_dim))
    b2 = jnp.zeros((hidden_dim,), jnp.float32)

    # fc_mean: orthogonal init with gain 0.01, zero bias
    a = jax.random.normal(k3, (hidden_dim, action_dim), jnp.float32)
    q, r = jnp.linalg.qr(a)
    q = q * jnp.sign(jnp.diagonal(r))[None, :]
    wm = 0.01 * q                                   # (H, A)
    bm = jnp.zeros((action_dim,), jnp.float32)

    # fc_logstd: weight=0, bias=log(initial_action_std)
    wls = jnp.zeros((hidden_dim, action_dim), jnp.float32)
    bls = jnp.full((action_dim,), np.log(initial_action_std), jnp.float32)

    # Packed / fused layout for the kernel.
    wh = jnp.concatenate([wm, wls], axis=1)         # (H, 2A)
    bh = jnp.concatenate([bm, bls])[None, :]        # (1, 2A)
    b12 = jnp.stack([b1, b2], axis=0)               # (2, H)

    return {
        "w1": w1.astype(jnp.bfloat16),
        "w2": w2.astype(jnp.bfloat16),
        "wh": wh.astype(jnp.bfloat16),
        "b12": b12,
        "bh": bh,
    }


def actor_forward_ref(features, params):
    """Pure-JAX reference of Actor.forward (same bf16-weight precision path)."""
    x = features.astype(jnp.bfloat16)
    h1 = jnp.maximum(
        jnp.dot(x, params["w1"], preferred_element_type=jnp.float32)
        + params["b12"][0:1, :], 0.0)
    h2 = jnp.maximum(
        jnp.dot(h1.astype(jnp.bfloat16), params["w2"],
                preferred_element_type=jnp.float32)
        + params["b12"][1:2, :], 0.0)
    heads = jnp.dot(h2.astype(jnp.bfloat16), params["wh"],
                    preferred_element_type=jnp.float32) + params["bh"]
    A = params["wh"].shape[1] // 2
    mean = jnp.tanh(heads[:, :A])
    log_std = jnp.clip(heads[:, A:], LOG_STD_MIN, LOG_STD_MAX)
    return mean, log_std


if __name__ == "__main__":
    # TODO(synk): only the learned-std path (fixed_std=False) is implemented;
    # the fixed_std branch just broadcasts a constant and needs no kernel.
    FEATURES_DIM, ACTION_DIM = 32, 4

    key = jax.random.PRNGKey(0)
    kx_small, kp, kx_big = jax.random.split(key, 3)

    params = init_actor_params(kp, FEATURES_DIM, ACTION_DIM,
                               hidden_dim=HIDDEN_DIM, initial_action_std=1.0)

    # Small batch -> single-block (gridless) path.
    feats_small = jax.random.normal(kx_small, (8, FEATURES_DIM), jnp.float32)
    mean_s, logstd_s = actor_forward(feats_small, params)

    # Larger rollout batch -> batch-tiled grid path (megacore-parallel on v7x).
    feats_big = jax.random.normal(kx_big, (512, FEATURES_DIM), jnp.float32)
    mean_b, logstd_b = actor_forward(feats_big, params)

    jax.block_until_ready((mean_s, logstd_s, mean_b, logstd_b))

    for feats, m, ls in ((feats_small, mean_s, logstd_s),
                         (feats_big, mean_b, logstd_b)):
        m_ref, ls_ref = actor_forward_ref(feats, params)
        np.testing.assert_allclose(np.asarray(m), np.asarray(m_ref),
                                   rtol=1e-3, atol=1e-3)
        np.testing.assert_allclose(np.asarray(ls), np.asarray(ls_ref),
                                   rtol=1e-3, atol=1e-3)

    print("KERNEL_OK")
</pallas_src>

<mosaic_0001>
module attributes {stable_mosaic.version = 11 : i64} {
  func.func @actor_kernel(%arg0: memref<8x32xf32, #tpu.memory_space<vmem>>, %arg1: memref<32x256xbf16, #tpu.memory_space<vmem>>, %arg2: memref<256x256xbf16, #tpu.memory_space<vmem>>, %arg3: memref<256x8xbf16, #tpu.memory_space<vmem>>, %arg4: memref<2x256xf32, #tpu.memory_space<vmem>>, %arg5: memref<1x8xf32, #tpu.memory_space<vmem>>, %arg6: memref<8x8xf32, #tpu.memory_space<vmem>>) attributes {dimension_semantics = [], scalar_prefetch = 0 : i64, scratch_operands = 0 : i64, tpu.core_type = #tpu.core_type<tc>} {
    %c0 = arith.constant 0 : index
    %c0_0 = arith.constant 0 : index
    %0 = vector.load %arg0[%c0, %c0_0] : memref<8x32xf32, #tpu.memory_space<vmem>>, vector<8x32xf32>
    %1 = arith.truncf %0 : vector<8x32xf32> to vector<8x32xbf16>
    %c0_1 = arith.constant 0 : index
    %c0_2 = arith.constant 0 : index
    %2 = vector.load %arg1[%c0_1, %c0_2] : memref<32x256xbf16, #tpu.memory_space<vmem>>, vector<32x256xbf16>
    %cst = arith.constant dense<0.000000e+00> : vector<8x256xf32>
    %3 = tpu.matmul %1, %2, %cst {dimension_numbers = #tpu.dot_dimension_numbers<[1], [0], [0], [1], [0, 0, 1, 1], [], []>} : vector<8x32xbf16>, vector<32x256xbf16>, vector<8x256xf32> -> vector<8x256xf32>
    %c0_3 = arith.constant 0 : index
    %c0_4 = arith.constant 0 : index
    %4 = vector.load %arg4[%c0_3, %c0_4] : memref<2x256xf32, #tpu.memory_space<vmem>>, vector<1x256xf32>
    %5 = vector.broadcast %4 : vector<1x256xf32> to vector<8x256xf32>
    %6 = arith.addf %3, %5 : vector<8x256xf32>
    %cst_5 = arith.constant 0.000000e+00 : f32
    %7 = vector.broadcast %cst_5 : f32 to vector<8x256xf32>
    %8 = arith.maximumf %6, %7 : vector<8x256xf32>
    %9 = arith.truncf %8 : vector<8x256xf32> to vector<8x256xbf16>
    %c0_6 = arith.constant 0 : index
    %c0_7 = arith.constant 0 : index
    %10 = vector.load %arg2[%c0_6, %c0_7] : memref<256x256xbf16, #tpu.memory_space<vmem>>, vector<256x256xbf16>
    %cst_8 = arith.constant dense<0.000000e+00> : vector<8x256xf32>
    %11 = tpu.matmul %9, %10, %cst_8 {dimension_numbers = #tpu.dot_dimension_numbers<[1], [0], [0], [1], [0, 0, 1, 1], [], []>} : vector<8x256xbf16>, vector<256x256xbf16>, vector<8x256xf32> -> vector<8x256xf32>
    %c1 = arith.constant 1 : index
    %c0_9 = arith.constant 0 : index
    %12 = vector.load %arg4[%c1, %c0_9] : memref<2x256xf32, #tpu.memory_space<vmem>>, vector<1x256xf32>
    %13 = vector.broadcast %12 : vector<1x256xf32> to vector<8x256xf32>
    %14 = arith.addf %11, %13 : vector<8x256xf32>
    %cst_10 = arith.constant 0.000000e+00 : f32
    %15 = vector.broadcast %cst_10 : f32 to vector<8x256xf32>
    %16 = arith.maximumf %14, %15 : vector<8x256xf32>
    %17 = arith.truncf %16 : vector<8x256xf32> to vector<8x256xbf16>
    %c0_11 = arith.constant 0 : index
    %c0_12 = arith.constant 0 : index
    %18 = vector.load %arg3[%c0_11, %c0_12] : memref<256x8xbf16, #tpu.memory_space<vmem>>, vector<256x8xbf16>
    %cst_13 = arith.constant dense<0.000000e+00> : vector<8x8xf32>
    %19 = tpu.matmul %17, %18, %cst_13 {dimension_numbers = #tpu.dot_dimension_numbers<[1], [0], [0], [1], [0, 0, 1, 1], [], []>} : vector<8x256xbf16>, vector<256x8xbf16>, vector<8x8xf32> -> vector<8x8xf32>
    %c0_14 = arith.constant 0 : index
    %c0_15 = arith.constant 0 : index
    %20 = vector.load %arg5[%c0_14, %c0_15] : memref<1x8xf32, #tpu.memory_space<vmem>>, vector<1x8xf32>
    %21 = vector.broadcast %20 : vector<1x8xf32> to vector<8x8xf32>
    %22 = arith.addf %19, %21 : vector<8x8xf32>
    %23 = tpu.iota {dimensions = array<i32: 1>} : vector<8x8xi32>
    %c4_i32 = arith.constant 4 : i32
    %24 = vector.broadcast %c4_i32 : i32 to vector<8x8xi32>
    %25 = arith.cmpi slt, %23, %24 : vector<8x8xi32>
    %26 = math.tanh %22 : vector<8x8xf32>
    %cst_16 = arith.constant -2.000000e+01 : f32
    %cst_17 = arith.constant 2.000000e+00 : f32
    %27 = vector.broadcast %cst_16 : f32 to vector<8x8xf32>
    %28 = arith.maximumf %27, %22 : vector<8x8xf32>
    %29 = vector.broadcast %cst_17 : f32 to vector<8x8xf32>
    %30 = arith.minimumf %29, %28 : vector<8x8xf32>
    %31 = arith.select %25, %26, %30 : vector<8x8xi1>, vector<8x8xf32>
    %c0_18 = arith.constant 0 : index
    %c0_19 = arith.constant 0 : index
    %32 = vector.load %arg6[%c0_18, %c0_19] : memref<8x8xf32, #tpu.memory_space<vmem>>, vector<8x8xf32>
    tpu.vector_store %arg6[%c0_18, %c0_19], %31 {strides = array<i32>} : memref<8x8xf32, #tpu.memory_space<vmem>>, vector<8x8xf32>,
    return
  }
}

</mosaic_0001>

<bundles_post_ra>
// kernel: tpu_custom_call.1
= control target key start
LH: loop header
LB: loop body
LE: loop exit
PB: predicated region body
PF: predicated region fallthrough
CT: control target
= control target key end

     0   :  { %11 = vsyncpa [#allocation3], 0  ;;  %s913_s0 = inlined_call_operand.vmem [shape: f32[8,32], index: 0, kind: input, shape index: {}]   ;;  %s914_s1 = inlined_call_operand.vmem [shape: bf16[32,256], index: 1, kind: input, shape index: {}]   ;;  %s915_s2 = inlined_call_operand.hbm [shape: bf16[256,256], index: 2, kind: input, shape index: {}]   ;;  %s916_s3 = inlined_call_operand.vmem [shape: bf16[256,8], index: 3, kind: input, shape index: {}]   ;;  %s917_s4 = inlined_call_operand.vmem [shape: f32[2,256], index: 4, kind: input, shape index: {}]   ;;  %s918_s5 = inlined_call_operand.vmem [shape: f32[1,8], index: 5, kind: input, shape index: {}]   ;;  %s919_s6 = inlined_call_operand.hbm [shape: f32[8,8], index: 6, kind: output, shape index: {}]  }
   0x1   :  { %12 = vsyncpa [#allocation4], 0  ;;  %s777_s21 = smov [#allocation2]   ;;  %s729_s25 = scalar_lea.hbm %s915_s2, 4096 }
   0x2   :  { %s22_s22 = sshll.u32 %s777_s21, 4  ;;  %p730_p0 = scmp.ne.s32.totalorder %s915_s2, %s729_s25  ;;  %s23_s22 = int_to_ptr.vmem [resolvable:$true] %s22_s22 }
   0x3   :  { %p733_p1 = scmp.lt.u32.totalorder %s729_s25, %s915_s2 }
   0x5   :  { %p735_p2 = pnand %p733_p1, %p730_p0 }
   0x7   :  { %738 = shalt.err (!%p735_p2)
}
   0x8   :  { %s739_s30 = scalar_lea.vmem %s23_s22, 4096  ;;  %p744_p4 = scmp.lt.s32.totalorder %s23_s22, %s23_s22 }
   0x9   :  { %p740_p3 = scmp.ne.s32.totalorder %s23_s22, %s739_s30  ;;  %p745_p5 = scmp.lt.s32.totalorder %s739_s30, %s739_s30 }
   0xb   :  { %p746_p6 = por %p745_p5, %p744_p4 }
   0xd   :  { %p747_p7 = pnand %p746_p6, %p740_p3 }
   0xf   :  { %750 = shalt.err (!%p747_p7)
}
  0x10   :  { %s778_s7 = smov 128   ;;  %s779_s8 = smov 8  }
  0x11   :  { %28 = dma.hbm_to_vmem [thread:$0]  %s915_s2, 4096, %s23_s22, [#allocation3], %s778_s7, %s778_s7, %s779_s8  }
  0x12   :  { %773 = dma.done.wait [#allocation3], 4096  }
  0x13   :  { %774 = vsyncadd [#allocation3], 4294963200  ;;  %v780_v0 = vmov 0   ;;  %v657_v1 = vld [vmem:[%s914_s1 + $0x4] ss:$8 sps:$4 sm:$0xff]   ;;  %vm77_vm0 = vcmask 261120   ;;  %v47_v51 = vlaneseq }
  0x14   :  { %113 = vmatprep.mubr.bf16.mxu0 %v780_v0  ;;  %v659_v2 = vld [vmem:[%s914_s1] ss:$8 sps:$4 sm:$0xff]   ;;  %81 = vmatprep.subr.bf16.mxu0 %v657_v1  ;;  %v660_v3 = vld [vmem:[%s914_s1 + $0x14] ss:$8 sps:$4 sm:$0xff]   ;;  %v662_v4 = vld [vmem:[%s914_s1 + $0x10] ss:$8 sps:$4 sm:$0xff]  }
  0x15   :  { %v39_v5 = vld [vmem:[%s913_s0] sm:$0xff]  ;;  %82 = vmatpush1.bf16.msra.mxu0 %v659_v2  ;;  %v666_v8 = vld [vmem:[#allocation2 + $0x14] ss:$8 sps:$4 sm:$0xff]   ;;  %v668_v10 = vld [vmem:[#allocation2 + $0x10] ss:$8 sps:$4 sm:$0xff]   ;;  %v48_v52 = vshrl.u32 %v47_v51, 7 }
  0x16   :  { %v663_v6 = vld [vmem:[#allocation2 + $0x4] ss:$8 sps:$4 sm:$0xff]   ;;  %83 = vmatprep.subr.bf16.mxu0 %v660_v3  ;;  %v665_v7 = vld [vmem:[#allocation2] ss:$8 sps:$4 sm:$0xff]   ;;  %v40_v9 = vpack.c.bf16 %v39_v5, %v39_v5  ;;  %v672_v13 = vld [vmem:[#allocation2 + $0x34] ss:$8 sps:$4 sm:$0xff]  }
  0x17   :  { %331 = vmatprep.subr.bf16.mxu1 %v663_v6  ;;  %v669_v11 = vld [vmem:[#allocation2 + $0x24] ss:$8 sps:$4 sm:$0xff]   ;;  %v671_v12 = vld [vmem:[#allocation2 + $0x20] ss:$8 sps:$4 sm:$0xff]   ;;  %v674_v14 = vld [vmem:[#allocation2 + $0x30] ss:$8 sps:$4 sm:$0xff]  }
  0x18   :  { %332 = vmatpush1.bf16.msra.mxu1 %v665_v7  ;;  %v675_v15 = vld [vmem:[#allocation2 + $0x44] ss:$8 sps:$4 sm:$0xff]   ;;  %v677_v16 = vld [vmem:[#allocation2 + $0x40] ss:$8 sps:$4 sm:$0xff]   ;;  %v678_v17 = vld [vmem:[#allocation2 + $0x54] ss:$8 sps:$4 sm:$0xff]  }
  0x19   :  { %84 = vmatpush1.bf16.msra.mxu0 %v662_v4  ;;  %333 = vmatprep.subr.bf16.mxu1 %v666_v8  ;;  %v680_v18 = vld [vmem:[#allocation2 + $0x50] ss:$8 sps:$4 sm:$0xff]   ;;  %v681_v19 = vld [vmem:[#allocation2 + $0x64] ss:$8 sps:$4 sm:$0xff]   ;;  %v683_v20 = vld [vmem:[#allocation2 + $0x60] ss:$8 sps:$4 sm:$0xff]  }
  0x1a   :  { %v684_v21 = vld [vmem:[#allocation2 + $0x74] ss:$8 sps:$4 sm:$0xff]   ;;  %v686_v22 = vld [vmem:[#allocation2 + $0x70] ss:$8 sps:$4 sm:$0xff]   ;;  %v687_v23 = vld [vmem:[#allocation2 + $0x84] ss:$8 sps:$4 sm:$0xff]  }
  0x1b   :  { %v689_v24 = vld [vmem:[#allocation2 + $0x80] ss:$8 sps:$4 sm:$0xff]   ;;  %v690_v25 = vld [vmem:[#allocation2 + $0x94] ss:$8 sps:$4 sm:$0xff]   ;;  %v692_v26 = vld [vmem:[#allocation2 + $0x90] ss:$8 sps:$4 sm:$0xff]  }
  0x1c   :  { %579 = vmatmul.mubr.msk.bf16.vlgmr.msra.gmra.mrb[0].mxu0 %vm77_vm0, %v40_v9  ;;  %334 = vmatpush1.bf16.msra.mxu1 %v668_v10  ;;  %v693_v27 = vld [vmem:[#allocation2 + $0xa4] ss:$8 sps:$4 sm:$0xff]   ;;  %v695_v28 = vld [vmem:[#allocation2 + $0xa0] ss:$8 sps:$4 sm:$0xff]   ;;  %v696_v29 = vld [vmem:[#allocation2 + $0xb4] ss:$8 sps:$4 sm:$0xff]  }
  0x1d   :  { %335 = vmatprep.subr.bf16.mxu1 %v669_v11  ;;  %v698_v30 = vld [vmem:[#allocation2 + $0xb0] ss:$8 sps:$4 sm:$0xff]   ;;  %v699_v31 = vld [vmem:[#allocation2 + $0xc4] ss:$8 sps:$4 sm:$0xff]   ;;  %v701_v32 = vld [vmem:[#allocation2 + $0xc0] ss:$8 sps:$4 sm:$0xff]  }
  0x1e   :  { %v702_v33 = vld [vmem:[#allocation2 + $0xd4] ss:$8 sps:$4 sm:$0xff]   ;;  %v704_v34 = vld [vmem:[#allocation2 + $0xd0] ss:$8 sps:$4 sm:$0xff]   ;;  %v705_v35 = vld [vmem:[#allocation2 + $0xe4] ss:$8 sps:$4 sm:$0xff]  }
  0x1f   :  { %v707_v36 = vld [vmem:[#allocation2 + $0xe0] ss:$8 sps:$4 sm:$0xff]   ;;  %v708_v37 = vld [vmem:[#allocation2 + $0xf4] ss:$8 sps:$4 sm:$0xff]   ;;  %v710_v38 = vld [vmem:[#allocation2 + $0xf0] ss:$8 sps:$4 sm:$0xff]  }
  0x20   :  { %336 = vmatpush1.bf16.msra.mxu1 %v671_v12  ;;  %v711_v39 = vld [vmem:[%s916_s3 + $0x40] sm:$0xff]   ;;  %v713_v41 = vld [vmem:[%s916_s3 + $0x48] sm:$0xff]   ;;  %v715_v43 = vld [vmem:[%s916_s3 + $0x50] sm:$0xff]   ;;  %v49_v53 = vsub.s32 0, %v48_v52  ;;  %v53_v55 = vsub.s32 1, %v48_v52  ;;  %vm558_vm2 = vcmask 64512  }
  0x21   :  { %337 = vmatprep.subr.bf16.mxu1 %v672_v13  ;;  %v712_v40 = vld [vmem:[%s916_s3] sm:$0xff]   ;;  %630 = vmatprep.subr.bf16.mxu0 %v711_v39  ;;  %v714_v42 = vld [vmem:[%s916_s3 + $0x8] sm:$0xff]   ;;  %v716_v44 = vld [vmem:[%s916_s3 + $0x10] sm:$0xff]  }
  0x22   :  { %631 = vmatpush3.bf16.msra.mxu0 %v712_v40  ;;  %v717_v45 = vld [vmem:[%s916_s3 + $0x58] sm:$0xff]   ;;  %v719_v47 = vld [vmem:[%s916_s3 + $0x60] sm:$0xff]   ;;  %v721_v49 = vld [vmem:[%s916_s3 + $0x68] sm:$0xff]  }
  0x23   :  { %632 = vmatprep.subr.bf16.mxu0 %v713_v41  ;;  %v718_v46 = vld [vmem:[%s916_s3 + $0x18] sm:$0xff]   ;;  %v720_v48 = vld [vmem:[%s916_s3 + $0x20] sm:$0xff]   ;;  %v722_v50 = vld [vmem:[%s916_s3 + $0x28] sm:$0xff]  }
  0x24   :  { %338 = vmatpush1.bf16.msra.mxu1 %v674_v14  ;;  %v45_v54 = vld [vmem:[%s917_s4] ss:$2 sm:$0x3]  ;;  %v723_v4 = vld [vmem:[%s916_s3 + $0x70] sm:$0xff]   ;;  %v725_v6 = vld [vmem:[%s916_s3 + $0x78] sm:$0xff]  }
  0x25   :  { %339 = vmatprep.subr.bf16.mxu1 %v675_v15  ;;  %v50_v56 = vrot.slane %v45_v54, %v49_v53  ;;  %v54_v57 = vrot.slane %v45_v54, %v53_v55  ;;  %v724_v5 = vld [vmem:[%s916_s3 + $0x30] sm:$0xff]   ;;  %v726_v7 = vld [vmem:[%s916_s3 + $0x38] sm:$0xff]   ;;  %v580_v8 = vld [vmem:[%s917_s4 + $0x1] ss:$2 sm:$0x3]  ;;  %s781_s4 = smov [#allocation5]  }
  0x26   :  { %633 = vmatpush3.bf16.msra.mxu0 %v714_v42  ;;  %v164_v9 = vrot.slane %v580_v8, %v49_v53  ;;  %v168_v10 = vrot.slane %v580_v8, %v53_v55  ;;  %s566_s28 = sshll.u32 %s781_s4, 4  ;;  %s567_s28 = int_to_ptr.vmem [resolvable:$true] %s566_s28 }
  0x27   :  { %634 = vmatprep.subr.bf16.mxu0 %v715_v43  ;;  %s751_s29 = scalar_lea.vmem %s567_s28, 128  ;;  %p756_p9 = scmp.lt.s32.totalorder %s567_s28, %s567_s28 }
  0x28   :  { %340 = vmatpush1.bf16.msra.mxu1 %v677_v16  ;;  %p752_p8 = scmp.ne.s32.totalorder %s567_s28, %s751_s29  ;;  %p757_p10 = scmp.lt.s32.totalorder %s751_s29, %s751_s29 }
  0x29   :  { %341 = vmatprep.subr.bf16.mxu1 %v678_v17 }
  0x2a   :  { %635 = vmatpush3.bf16.msra.mxu0 %v716_v44  ;;  %p758_p11 = por %p757_p10, %p756_p9 }
  0x2b   :  { %636 = vmatprep.subr.bf16.mxu0 %v717_v45 }
  0x2c   :  { %342 = vmatpush1.bf16.msra.mxu1 %v680_v18  ;;  %p759_p12 = pnand %p758_p11, %p752_p8 }
  0x2d   :  { %343 = vmatprep.subr.bf16.mxu1 %v681_v19 }
  0x2e   :  { %637 = vmatpush3.bf16.msra.mxu0 %v718_v46 }
  0x2f   :  { %638 = vmatprep.subr.bf16.mxu0 %v719_v47 }
  0x30   :  { %344 = vmatpush1.bf16.msra.mxu1 %v683_v20 }
  0x31   :  { %345 = vmatprep.subr.bf16.mxu1 %v684_v21 }
  0x32   :  { %639 = vmatpush3.bf16.msra.mxu0 %v720_v48 }
  0x33   :  { %640 = vmatprep.subr.bf16.mxu0 %v721_v49 }
  0x34   :  { %346 = vmatpush1.bf16.msra.mxu1 %v686_v22  ;;  %v613_v22 = vld [vmem:[%s918_s5] ss:$0 sm:$0xff] }
  0x35   :  { %347 = vmatprep.subr.bf16.mxu1 %v687_v23 }
  0x36   :  { %641 = vmatpush3.bf16.msra.mxu0 %v722_v50 }
  0x37   :  { %642 = vmatprep.subr.bf16.mxu0 %v723_v4 }
  0x38   :  { %348 = vmatpush1.bf16.msra.mxu1 %v689_v24 }
  0x39   :  { %349 = vmatprep.subr.bf16.mxu1 %v690_v25 }
  0x3a   :  { %643 = vmatpush3.bf16.msra.mxu0 %v724_v5 }
  0x3b   :  { %644 = vmatprep.subr.bf16.mxu0 %v725_v6 }
  0x3c   :  { %350 = vmatpush1.bf16.msra.mxu1 %v692_v26 }
  0x3d   :  { %351 = vmatprep.subr.bf16.mxu1 %v693_v27 }
  0x3e   :  { %645 = vmatpush3.bf16.msra.mxu0 %v726_v7 }
  0x40   :  { %352 = vmatpush1.bf16.msra.mxu1 %v695_v28  ;;  %v552_v28 = vand.u32 127, %v47_v51 }
  0x41   :  { %353 = vmatprep.subr.bf16.mxu1 %v696_v29 }
  0x42   :  { %vm553_vm1 = vcmp.lt.s32.totalorder %v552_v28, 4 }
  0x44   :  { %354 = vmatpush1.bf16.msra.mxu1 %v698_v30 }
  0x45   :  { %355 = vmatprep.subr.bf16.mxu1 %v699_v31 }
  0x48   :  { %356 = vmatpush1.bf16.msra.mxu1 %v701_v32 }
  0x49   :  { %357 = vmatprep.subr.bf16.mxu1 %v702_v33 }
  0x4c   :  { %358 = vmatpush1.bf16.msra.mxu1 %v704_v34 }
  0x4d   :  { %359 = vmatprep.subr.bf16.mxu1 %v705_v35 }
  0x50   :  { %360 = vmatpush1.bf16.msra.mxu1 %v707_v36 }
  0x51   :  { %361 = vmatprep.subr.bf16.mxu1 %v708_v37 }
  0x54   :  { %362 = vmatpush1.bf16.msra.mxu1 %v710_v38 }
  0xef   :  { %v115_v58 = vpop.f32.mrb[0].mxu0 }
  0xf0   :  { %v116_v59 = vadd.f32 %v115_v58, %v50_v56  ;;  %v117_v60 = vpop.f32.mrb[1].mxu0 }
  0xf1   :  { %v118_v61 = vadd.f32 %v117_v60, %v54_v57  ;;  %v119_v62 = vpop.f32.mrb[2].mxu0 }
  0xf2   :  { %v122_v63 = vmax.f32 %v116_v59, 0.0  ;;  %v120_v0 = vpop.f32.mrb[3].mxu0 }
  0xf3   :  { %v123_v1 = vmax.f32 %v118_v61, 0.0 }
  0xf4   :  { %v124_v3 = vpack.c.bf16 %v122_v63, %v122_v63 }
  0xf5   :  { %v125_v2 = vpack.c.bf16 %v123_v1, %v123_v1 }
  0xf7   :  { %363 = vmatprep.mubr.bf16.mxu1 %v125_v2 }
  0xf8   :  { %364 = vmatmul.mubr.bf16.vlgmr.msra.gmra.mrb[0].mxu1 %v124_v3 }
 0x1cb   :  { %v365_v11 = vpop.f32.mrb[0].mxu1 }
 0x1cc   :  { %v366_v12 = vadd.f32 %v365_v11, %v164_v9  ;;  %v367_v13 = vpop.f32.mrb[1].mxu1 }
 0x1cd   :  { %v368_v14 = vadd.f32 %v367_v13, %v168_v10  ;;  %v369_v15 = vpop.f32.mrb[2].mxu1 }
 0x1ce   :  { %v372_v16 = vmax.f32 %v366_v12, 0.0  ;;  %v370_v17 = vpop.f32.mrb[3].mxu1 }
 0x1cf   :  { %v373_v18 = vmax.f32 %v368_v14, 0.0 }
 0x1d0   :  { %v374_v20 = vpack.c.bf16 %v372_v16, %v372_v16 }
 0x1d1   :  { %v375_v19 = vpack.c.bf16 %v373_v18, %v373_v18 }
 0x1d3   :  { %543 = vmatprep.mubr.bf16.mxu0 %v375_v19 }
 0x1d4   :  { %544 = vmatmul.mubr.bf16.vlgmr.msra.gmra.mrb[4].mxu0 %v374_v20 }
 0x2a7   :  { %v646_v21 = vpop.f32.mrb[4].mxu0 }
 0x2a8   :  { %v647_v23 = vpop.f32.mrb[5].mxu0 }
 0x2a9   :  { %v648_v24 = vadd.f32 %v647_v23, %v646_v21  ;;  %v649_v25 = vpop.f32.mrb[6].mxu0 }
 0x2aa   :  { %v650_v26 = vpop.f32.mrb[7].mxu0 }
 0x2ab   :  { %v546_v27 = vadd.f32 %v648_v24, %v613_v22 }
 0x2ad   :  { %727 = vtanh.f32 %v546_v27  ;;  %v555_v29 = vmax.f32 %v546_v27, -20.0 }
 0x2af   :  { %v556_v30 = vmin.f32 %v555_v29, 2.0 }
 0x2b7   :  { %v728_v31 = vpop.eup %727 }
 0x2b8   :  { %v557_v32 = vsel %vm553_vm1, %v728_v31, %v556_v30 }
 0x2b9   :  { %559 = vst.msk [vmem:[#allocation5] sm:$0xff] %vm558_vm2, %v557_v32 }
 0x2ba   :  { %762 = shalt.err (!%p759_p12)
}
 0x2bb   :  { %s763_s7 = scalar_lea.hbm %s919_s6, 128 }
 0x2bc   :  { %p764_p13 = scmp.ne.s32.totalorder %s919_s6, %s763_s7  ;;  %p767_p0 = scmp.lt.u32.totalorder %s763_s7, %s919_s6 }
 0x2be   :  { %p769_p1 = pnand %p767_p0, %p764_p13 }
 0x2c0   :  { %772 = shalt.err (!%p769_p1)
}
 0x2c1   :  { %569 = dma.vmem_to_hbm [thread:$0]  %s567_s28, 128, %s919_s6, [#allocation4]  }
 0x2c2   :  { %775 = dma.done.wait [#allocation4], 128  }
 0x2c3   :  { %776 = vsyncadd [#allocation4], 4294967168 }
 0x2c4   :  { %573 = vsyncpa [#allocation3], 1 }
 0x2c5   :  { %574 = vsyncpa [#allocation4], 1 }

</bundles_post_ra>
